<compile_context>
chip_gen: v7x
topology: tpu7x:2x2x1
jax: 0.10.0
libtpu: 0.0.40
codegen_flags: <defaults>
</compile_context>

<pallas_src>
import functools

import jax
import jax.numpy as jnp
from jax.experimental import pallas as pl
from jax.experimental.pallas import tpu as pltpu

_EPS = 1e-5
_VBS = 128  # TabNet Ghost BatchNorm virtual batch size


# ---------------------------------------------------------------------------
# pure-JAX reference: original, unfused per-step math (used only for checking)
# ---------------------------------------------------------------------------
def _batchnorm_train(h, gamma, beta):
    mean = jnp.mean(h, axis=0, keepdims=True)
    var = jnp.mean((h - mean) ** 2, axis=0, keepdims=True)
    return (h - mean) * jax.lax.rsqrt(var + _EPS) * gamma + beta


def _gbn_train(h, gamma, beta, vbs=_VBS):
    """Ghost BatchNorm, training mode, B <= vbs or B a multiple of vbs."""
    b = h.shape[0]
    if b <= vbs:
        return _batchnorm_train(h, gamma, beta)
    assert b % vbs == 0
    chunks = [_batchnorm_train(h[i * vbs:(i + 1) * vbs], gamma, beta) for i in range(b // vbs)]
    return jnp.concatenate(chunks, axis=0)


def _decoder_tabnet_reference(x, w_shared, gamma_sh, beta_sh, w_spec, gamma_sp, beta_sp,
                              w_rec, w1, b1, w2, b2):
    d = x.shape[1]
    n_steps = w_spec.shape[0]
    scale = jnp.sqrt(jnp.float32(0.5))
    res = jnp.zeros((x.shape[0], d), jnp.float32)
    for s in range(n_steps):
        h = jnp.dot(x, w_shared, preferred_element_type=jnp.float32)
        h = _gbn_train(h, gamma_sh[s], beta_sh[s])
        u = h[:, :d] * jax.nn.sigmoid(h[:, d:])
        g = jnp.dot(u, w_spec[s], preferred_element_type=jnp.float32)
        g = _gbn_train(g, gamma_sp[s], beta_sp[s])
        v = g[:, :d] * jax.nn.sigmoid(g[:, d:])
        res = res + (u + v) * scale
    rec = jnp.dot(res, w_rec, preferred_element_type=jnp.float32)
    h1 = jnp.maximum(jnp.dot(rec, w1, preferred_element_type=jnp.float32) + b1, 0.0)
    return jnp.maximum(jnp.dot(h1, w2, preferred_element_type=jnp.float32) + b2, 0.0)


# ---------------------------------------------------------------------------
# Pallas kernel (one grid point per 128-row virtual batch; weights fully resident in VMEM)
# ---------------------------------------------------------------------------
def _decoder_tabnet_kernel(x_ref, wsh_ref, wbd_ref, wa_ref, w2_ref, aff_ref, bias_ref, out_ref):
    d = x_ref.shape[1]
    sd = wbd_ref.shape[0]                 # S * D
    mm_dtype = wsh_ref.dtype              # f32 or bf16 (MXU operands only)

    aff = aff_ref[...]                    # [8, S*D] f32: gsh_lin,bsh_lin,gsh_gate,bsh_gate,
                                          #               gsp_lin,bsp_lin,gsp_gate,bsp_gate
    bias = bias_ref[...]                  # [1, D + O_pad] f32
    b1 = bias[:, :d]
    b2 = bias[:, d:]

    # ---- shared GLU branch: the S-fold lin/gate replication is pre-folded into wsh_rep's
    #      columns, so there is no in-kernel tiling/concatenation.  Per-column batch stats of the
    #      replicated result equal the per-step shared-BN stats exactly. ----
    h = jnp.dot(x_ref[...].astype(mm_dtype), wsh_ref[...],
                preferred_element_type=jnp.float32)                          # [VB, 2*S*D]
    mu = jnp.mean(h, axis=0, keepdims=True)
    inv = jax.lax.rsqrt(jnp.mean((h - mu) ** 2, axis=0, keepdims=True) + _EPS)
    hn = (h - mu) * inv
    u_all = (hn[:, :sd] * aff[0:1] + aff[1:2]) * jax.nn.sigmoid(hn[:, sd:] * aff[2:3] + aff[3:4])

    # ---- step-specific GLU branch: one fused block-diagonal MXU pass + one BN reduction ----
    g = jnp.dot(u_all.astype(mm_dtype), wbd_ref[...],
                preferred_element_type=jnp.float32)                          # [VB, 2*S*D]
    mu2 = jnp.mean(g, axis=0, keepdims=True)
    inv2 = jax.lax.rsqrt(jnp.mean((g - mu2) ** 2, axis=0, keepdims=True) + _EPS)
    gn = (g - mu2) * inv2
    v_all = (gn[:, :sd] * aff[4:5] + aff[5:6]) * jax.nn.sigmoid(gn[:, sd:] * aff[6:7] + aff[7:8])

    sum_all = u_all + v_all                                                  # [VB, S*D]

    # ---- residual step-sum + sqrt(0.5) + reconstruction Linear + TransformLayer Linear1 are all
    #      folded into wa_ref (= sqrt(0.5) * tile(W_rec @ W1, (S, 1))): the sum over steps rides
    #      the matmul K dimension, no lane-slice accumulation loop. ----
    h1 = jnp.maximum(jnp.dot(sum_all.astype(mm_dtype), wa_ref[...],
                             preferred_element_type=jnp.float32) + b1, 0.0)  # [VB, D]
    out = jnp.maximum(jnp.dot(h1.astype(mm_dtype), w2_ref[...],
                              preferred_element_type=jnp.float32) + b2, 0.0) # [VB, O_pad]
    out_ref[...] = out.astype(out_ref.dtype)


# ---------------------------------------------------------------------------
# one-time parameter packing (call ONCE at init; NOT part of the per-call jitted path)
# ---------------------------------------------------------------------------
def pack_params(params, *, matmul_dtype=jnp.float32):
    (w_shared, gamma_sh, beta_sh, w_spec, gamma_sp, beta_sp, w_rec, w1, b1, w2, b2) = params
    s, d = int(w_spec.shape[0]), int(w_spec.shape[1])
    sd = s * d
    o = int(w2.shape[1])

    # shared FC with lin / gate columns replicated per step (all lin halves | all gate halves)
    wsh_rep = jnp.concatenate(
        [jnp.tile(w_shared[:, :d], (1, s)), jnp.tile(w_shared[:, d:], (1, s))], axis=1)  # [D, 2*S*D]

    # block-diagonal step-specific FC, columns grouped (all lin halves | all gate halves)
    eye = jnp.eye(s, dtype=jnp.float32)[:, None, :, None]                    # [S,1,S,1]
    wbd_lin = (eye * w_spec[:, :, None, :d]).reshape(sd, sd)
    wbd_gate = (eye * w_spec[:, :, None, d:]).reshape(sd, sd)
    wbd = jnp.concatenate([wbd_lin, wbd_gate], axis=1)                       # [S*D, 2*S*D]

    # fold residual step-sum + sqrt(0.5) + reconstruction Linear + TransformLayer Linear1
    wa = jnp.sqrt(jnp.float32(0.5)) * jnp.dot(w_rec, w1, preferred_element_type=jnp.float32)
    wa_tiled = jnp.tile(wa, (s, 1))                                          # [S*D, D]

    # lane-dense output: pad O up to a multiple of 128 (padded columns are exactly zero after relu)
    o_pad = max(128, ((o + 127) // 128) * 128)
    w2_pad = jnp.zeros((d, o_pad), jnp.float32).at[:, :o].set(w2)
    b2_pad = jnp.zeros((1, o_pad), jnp.float32).at[:, :o].set(b2)

    # packed BN affine parameters; column s*D + j <-> (step s, feature j); kept in f32 always
    gsh = gamma_sh.reshape(s, 2 * d)
    bsh = beta_sh.reshape(s, 2 * d)
    gsp = gamma_sp.reshape(s, 2 * d)
    bsp = beta_sp.reshape(s, 2 * d)
    aff = jnp.stack([
        gsh[:, :d].reshape(sd), bsh[:, :d].reshape(sd),
        gsh[:, d:].reshape(sd), bsh[:, d:].reshape(sd),
        gsp[:, :d].reshape(sd), bsp[:, :d].reshape(sd),
        gsp[:, d:].reshape(sd), bsp[:, d:].reshape(sd),
    ], axis=0).astype(jnp.float32)                                           # [8, S*D]
    bias = jnp.concatenate([b1.astype(jnp.float32), b2_pad], axis=1)         # [1, D + O_pad]

    mm = matmul_dtype  # bf16 for v6e/v7x MXU; elementwise/BN math stays f32 in the kernel (v5e-safe)
    return (wsh_rep.astype(mm), wbd.astype(mm), wa_tiled.astype(mm), w2_pad.astype(mm), aff, bias)


# ---------------------------------------------------------------------------
# jitted forward: only the pallas_call (+ the final un-pad slice)
# ---------------------------------------------------------------------------
@functools.partial(jax.jit, static_argnames=("out_features",))
def decoder_tabnet_forward(x, packed, *, out_features):
    wsh_rep, wbd, wa_tiled, w2_pad, aff, bias = packed
    b, d = x.shape
    o_pad = w2_pad.shape[1]

    # virtual-batch grid: per-block BN stats == Ghost BatchNorm; "parallel" -> shards over v7x's TCs
    vb = _VBS if b >= _VBS else b
    assert b % vb == 0, "Ghost BatchNorm path requires B <= 128 or B a multiple of 128"
    nvb = b // vb

    def fixed(arr):
        nd = arr.ndim
        return pl.BlockSpec(arr.shape, lambda i, _n=nd: (0,) * _n)

    out_padded = pl.pallas_call(
        _decoder_tabnet_kernel,
        out_shape=jax.ShapeDtypeStruct((b, o_pad), jnp.float32),
        grid=(nvb,),
        in_specs=[
            pl.BlockSpec((vb, d), lambda i: (i, 0)),     # x: one virtual batch per grid point
            fixed(wsh_rep), fixed(wbd), fixed(wa_tiled), fixed(w2_pad),
            fixed(aff), fixed(bias),
        ],
        out_specs=pl.BlockSpec((vb, o_pad), lambda i: (i, 0)),
        compiler_params=pltpu.CompilerParams(dimension_semantics=("parallel",)),
    )(x, wsh_rep, wbd, wa_tiled, w2_pad, aff, bias)
    return out_padded[:, :out_features]


def make_params(key, d_model, num_layers, output_size):
    S, D, O = num_layers, d_model, output_size
    ks = jax.random.split(key, 6)
    # Linear weights pre-transposed to [in, out]; BN gamma=1 / beta=0 (PyTorch defaults).
    w_shared = jax.random.normal(ks[0], (D, 2 * D), jnp.float32) * 0.2
    w_spec = jax.random.normal(ks[1], (S, D, 2 * D), jnp.float32) * 0.2
    w_rec = jax.random.normal(ks[2], (D, D), jnp.float32) * 0.2
    w1 = jax.random.normal(ks[3], (D, D), jnp.float32) * 0.2
    w2 = jax.random.normal(ks[4], (D, O), jnp.float32) * 0.2
    b1 = jax.random.normal(ks[5], (1, D), jnp.float32) * 0.05
    b2 = jnp.zeros((1, O), jnp.float32)
    gamma_sh = jnp.ones((S, 1, 2 * D), jnp.float32)
    beta_sh = jnp.zeros((S, 1, 2 * D), jnp.float32)
    gamma_sp = jnp.ones((S, 1, 2 * D), jnp.float32)
    beta_sp = jnp.zeros((S, 1, 2 * D), jnp.float32)
    return (w_shared, gamma_sh, beta_sh, w_spec, gamma_sp, beta_sp, w_rec, w1, b1, w2, b2)


if __name__ == "__main__":
    D, S, O = 32, 3, 16                       # d_model, num_layers, output_size
    key = jax.random.PRNGKey(0)
    kx, kp, kx2 = jax.random.split(key, 3)
    params = make_params(kp, D, S, O)

    # pack parameters ONCE (outside the jitted hot path)
    packed_f32 = pack_params(params)
    packed_bf16 = pack_params(params, matmul_dtype=jnp.bfloat16)

    # --- small batch: single ghost-BN chunk, grid=(1,) ---
    x_small = jax.random.normal(kx, (8, D), jnp.float32)
    out = jax.block_until_ready(decoder_tabnet_forward(x_small, packed_f32, out_features=O))
    ref = _decoder_tabnet_reference(x_small, *params)
    assert out.shape == (8, O)
    assert jnp.allclose(out, ref, atol=2e-4, rtol=2e-4), float(jnp.max(jnp.abs(out - ref)))

    # --- batched: two 128-row virtual batches -> grid=(2,) "parallel", per-block ghost-BN stats ---
    x_big = jax.random.normal(kx2, (256, D), jnp.float32)
    out_big = jax.block_until_ready(decoder_tabnet_forward(x_big, packed_f32, out_features=O))
    ref_big = _decoder_tabnet_reference(x_big, *params)
    assert out_big.shape == (256, O)
    assert jnp.allclose(out_big, ref_big, atol=2e-4, rtol=2e-4), float(jnp.max(jnp.abs(out_big - ref_big)))

    # --- bf16 MXU-operand variant (v6e/v7x oriented); loose smoke check only ---
    out_bf16 = jax.block_until_ready(decoder_tabnet_forward(x_big, packed_bf16, out_features=O))
    assert out_bf16.shape == (256, O)
    assert bool(jnp.all(jnp.isfinite(out_bf16)))
    assert float(jnp.max(jnp.abs(out_bf16 - ref_big))) < 0.5

    print("KERNEL_OK")
</pallas_src>

<mosaic_0001>
module attributes {stable_mosaic.version = 11 : i64} {
  func.func @_decoder_tabnet_kernel(%arg0: i32, %arg1: memref<8x32xf32, #tpu.memory_space<vmem>>, %arg2: memref<32x192xf32, #tpu.memory_space<vmem>>, %arg3: memref<96x192xf32, #tpu.memory_space<vmem>>, %arg4: memref<96x32xf32, #tpu.memory_space<vmem>>, %arg5: memref<32x128xf32, #tpu.memory_space<vmem>>, %arg6: memref<8x96xf32, #tpu.memory_space<vmem>>, %arg7: memref<1x160xf32, #tpu.memory_space<vmem>>, %arg8: memref<8x128xf32, #tpu.memory_space<vmem>>) attributes {dimension_semantics = [#tpu.dimension_semantics<parallel>], iteration_bounds = array<i64: 1>, scalar_prefetch = 0 : i64, scratch_operands = 0 : i64, tpu.core_type = #tpu.core_type<tc>, window_params = [{transform_indices = @transform_0, window_bounds = array<i64: 8, 32>}, {pipeline_mode = #tpu.pipeline_mode<synchronous>, transform_indices = @transform_1, window_bounds = array<i64: 32, 192>}, {pipeline_mode = #tpu.pipeline_mode<synchronous>, transform_indices = @transform_2, window_bounds = array<i64: 96, 192>}, {pipeline_mode = #tpu.pipeline_mode<synchronous>, transform_indices = @transform_3, window_bounds = array<i64: 96, 32>}, {pipeline_mode = #tpu.pipeline_mode<synchronous>, transform_indices = @transform_4, window_bounds = array<i64: 32, 128>}, {pipeline_mode = #tpu.pipeline_mode<synchronous>, transform_indices = @transform_5, window_bounds = array<i64: 8, 96>}, {pipeline_mode = #tpu.pipeline_mode<synchronous>, transform_indices = @transform_6, window_bounds = array<i64: 1, 160>}, {transform_indices = @transform_7, window_bounds = array<i64: 8, 128>}]} {
    %c0 = arith.constant 0 : index
    %c0_0 = arith.constant 0 : index
    %0 = vector.load %arg6[%c0, %c0_0] : memref<8x96xf32, #tpu.memory_space<vmem>>, vector<8x96xf32>
    %c0_1 = arith.constant 0 : index
    %c0_2 = arith.constant 0 : index
    %1 = vector.load %arg7[%c0_1, %c0_2] : memref<1x160xf32, #tpu.memory_space<vmem>>, vector<1x160xf32>
    %2 = vector.extract_strided_slice %1 {offsets = [0, 0], sizes = [1, 32], strides = [1, 1]} : vector<1x160xf32> to vector<1x32xf32>
    %3 = vector.extract_strided_slice %1 {offsets = [0, 32], sizes = [1, 128], strides = [1, 1]} : vector<1x160xf32> to vector<1x128xf32>
    %c0_3 = arith.constant 0 : index
    %c0_4 = arith.constant 0 : index
    %4 = vector.load %arg1[%c0_3, %c0_4] : memref<8x32xf32, #tpu.memory_space<vmem>>, vector<8x32xf32>
    %c0_5 = arith.constant 0 : index
    %c0_6 = arith.constant 0 : index
    %5 = vector.load %arg2[%c0_5, %c0_6] : memref<32x192xf32, #tpu.memory_space<vmem>>, vector<32x192xf32>
    %cst = arith.constant dense<0.000000e+00> : vector<8x192xf32>
    %6 = tpu.matmul %4, %5, %cst {dimension_numbers = #tpu.dot_dimension_numbers<[1], [0], [0], [1], [0, 0, 1, 1], [], []>} : vector<8x32xf32>, vector<32x192xf32>, vector<8x192xf32> -> vector<8x192xf32>
    %cst_7 = arith.constant dense<0.000000e+00> : vector<192xf32>
    %7 = vector.multi_reduction <add>, %6, %cst_7 [0] : vector<8x192xf32> to vector<192xf32>
    %8 = vector.shape_cast %7 : vector<192xf32> to vector<1x192xf32>
    %cst_8 = arith.constant 8.000000e+00 : f32
    %9 = vector.broadcast %cst_8 : f32 to vector<1x192xf32>
    %10 = arith.divf %8, %9 : vector<1x192xf32>
    %11 = vector.broadcast %10 : vector<1x192xf32> to vector<8x192xf32>
    %12 = arith.subf %6, %11 : vector<8x192xf32>
    %13 = arith.mulf %12, %12 : vector<8x192xf32>
    %cst_9 = arith.constant dense<0.000000e+00> : vector<192xf32>
    %14 = vector.multi_reduction <add>, %13, %cst_9 [0] : vector<8x192xf32> to vector<192xf32>
    %15 = vector.shape_cast %14 : vector<192xf32> to vector<1x192xf32>
    %cst_10 = arith.constant 8.000000e+00 : f32
    %16 = vector.broadcast %cst_10 : f32 to vector<1x192xf32>
    %17 = arith.divf %15, %16 : vector<1x192xf32>
    %cst_11 = arith.constant 9.99999974E-6 : f32
    %18 = vector.broadcast %cst_11 : f32 to vector<1x192xf32>
    %19 = arith.addf %17, %18 : vector<1x192xf32>
    %20 = math.rsqrt %19 : vector<1x192xf32>
    %21 = vector.broadcast %10 : vector<1x192xf32> to vector<8x192xf32>
    %22 = arith.subf %6, %21 : vector<8x192xf32>
    %23 = vector.broadcast %20 : vector<1x192xf32> to vector<8x192xf32>
    %24 = arith.mulf %22, %23 : vector<8x192xf32>
    %25 = vector.extract_strided_slice %24 {offsets = [0, 0], sizes = [8, 96], strides = [1, 1]} : vector<8x192xf32> to vector<8x96xf32>
    %26 = vector.extract_strided_slice %0 {offsets = [0, 0], sizes = [1, 96], strides = [1, 1]} : vector<8x96xf32> to vector<1x96xf32>
    %27 = vector.broadcast %26 : vector<1x96xf32> to vector<8x96xf32>
    %28 = arith.mulf %25, %27 : vector<8x96xf32>
    %29 = vector.extract_strided_slice %0 {offsets = [1, 0], sizes = [1, 96], strides = [1, 1]} : vector<8x96xf32> to vector<1x96xf32>
    %30 = vector.broadcast %29 : vector<1x96xf32> to vector<8x96xf32>
    %31 = arith.addf %28, %30 : vector<8x96xf32>
    %32 = vector.extract_strided_slice %24 {offsets = [0, 96], sizes = [8, 96], strides = [1, 1]} : vector<8x192xf32> to vector<8x96xf32>
    %33 = vector.extract_strided_slice %0 {offsets = [2, 0], sizes = [1, 96], strides = [1, 1]} : vector<8x96xf32> to vector<1x96xf32>
    %34 = vector.broadcast %33 : vector<1x96xf32> to vector<8x96xf32>
    %35 = arith.mulf %32, %34 : vector<8x96xf32>
    %36 = vector.extract_strided_slice %0 {offsets = [3, 0], sizes = [1, 96], strides = [1, 1]} : vector<8x96xf32> to vector<1x96xf32>
    %37 = vector.broadcast %36 : vector<1x96xf32> to vector<8x96xf32>
    %38 = arith.addf %35, %37 : vector<8x96xf32>
    %39 = arith.negf %38 : vector<8x96xf32>
    %40 = math.exp %39 : vector<8x96xf32>
    %cst_12 = arith.constant 1.000000e+00 : f32
    %41 = vector.broadcast %cst_12 : f32 to vector<8x96xf32>
    %42 = arith.addf %41, %40 : vector<8x96xf32>
    %43 = arith.divf %41, %42 : vector<8x96xf32>
    %44 = arith.mulf %31, %43 : vector<8x96xf32>
    %c0_13 = arith.constant 0 : index
    %c0_14 = arith.constant 0 : index
    %45 = vector.load %arg3[%c0_13, %c0_14] : memref<96x192xf32, #tpu.memory_space<vmem>>, vector<96x192xf32>
    %cst_15 = arith.constant dense<0.000000e+00> : vector<8x192xf32>
    %46 = tpu.matmul %44, %45, %cst_15 {dimension_numbers = #tpu.dot_dimension_numbers<[1], [0], [0], [1], [0, 0, 1, 1], [], []>} : vector<8x96xf32>, vector<96x192xf32>, vector<8x192xf32> -> vector<8x192xf32>
    %cst_16 = arith.constant dense<0.000000e+00> : vector<192xf32>
    %47 = vector.multi_reduction <add>, %46, %cst_16 [0] : vector<8x192xf32> to vector<192xf32>
    %48 = vector.shape_cast %47 : vector<192xf32> to vector<1x192xf32>
    %cst_17 = arith.constant 8.000000e+00 : f32
    %49 = vector.broadcast %cst_17 : f32 to vector<1x192xf32>
    %50 = arith.divf %48, %49 : vector<1x192xf32>
    %51 = vector.broadcast %50 : vector<1x192xf32> to vector<8x192xf32>
    %52 = arith.subf %46, %51 : vector<8x192xf32>
    %53 = arith.mulf %52, %52 : vector<8x192xf32>
    %cst_18 = arith.constant dense<0.000000e+00> : vector<192xf32>
    %54 = vector.multi_reduction <add>, %53, %cst_18 [0] : vector<8x192xf32> to vector<192xf32>
    %55 = vector.shape_cast %54 : vector<192xf32> to vector<1x192xf32>
    %cst_19 = arith.constant 8.000000e+00 : f32
    %56 = vector.broadcast %cst_19 : f32 to vector<1x192xf32>
    %57 = arith.divf %55, %56 : vector<1x192xf32>
    %cst_20 = arith.constant 9.99999974E-6 : f32
    %58 = vector.broadcast %cst_20 : f32 to vector<1x192xf32>
    %59 = arith.addf %57, %58 : vector<1x192xf32>
    %60 = math.rsqrt %59 : vector<1x192xf32>
    %61 = vector.broadcast %50 : vector<1x192xf32> to vector<8x192xf32>
    %62 = arith.subf %46, %61 : vector<8x192xf32>
    %63 = vector.broadcast %60 : vector<1x192xf32> to vector<8x192xf32>
    %64 = arith.mulf %62, %63 : vector<8x192xf32>
    %65 = vector.extract_strided_slice %64 {offsets = [0, 0], sizes = [8, 96], strides = [1, 1]} : vector<8x192xf32> to vector<8x96xf32>
    %66 = vector.extract_strided_slice %0 {offsets = [4, 0], sizes = [1, 96], strides = [1, 1]} : vector<8x96xf32> to vector<1x96xf32>
    %67 = vector.broadcast %66 : vector<1x96xf32> to vector<8x96xf32>
    %68 = arith.mulf %65, %67 : vector<8x96xf32>
    %69 = vector.extract_strided_slice %0 {offsets = [5, 0], sizes = [1, 96], strides = [1, 1]} : vector<8x96xf32> to vector<1x96xf32>
    %70 = vector.broadcast %69 : vector<1x96xf32> to vector<8x96xf32>
    %71 = arith.addf %68, %70 : vector<8x96xf32>
    %72 = vector.extract_strided_slice %64 {offsets = [0, 96], sizes = [8, 96], strides = [1, 1]} : vector<8x192xf32> to vector<8x96xf32>
    %73 = vector.extract_strided_slice %0 {offsets = [6, 0], sizes = [1, 96], strides = [1, 1]} : vector<8x96xf32> to vector<1x96xf32>
    %74 = vector.broadcast %73 : vector<1x96xf32> to vector<8x96xf32>
    %75 = arith.mulf %72, %74 : vector<8x96xf32>
    %76 = vector.extract_strided_slice %0 {offsets = [7, 0], sizes = [1, 96], strides = [1, 1]} : vector<8x96xf32> to vector<1x96xf32>
    %77 = vector.broadcast %76 : vector<1x96xf32> to vector<8x96xf32>
    %78 = arith.addf %75, %77 : vector<8x96xf32>
    %79 = arith.negf %78 : vector<8x96xf32>
    %80 = math.exp %79 : vector<8x96xf32>
    %cst_21 = arith.constant 1.000000e+00 : f32
    %81 = vector.broadcast %cst_21 : f32 to vector<8x96xf32>
    %82 = arith.addf %81, %80 : vector<8x96xf32>
    %83 = arith.divf %81, %82 : vector<8x96xf32>
    %84 = arith.mulf %71, %83 : vector<8x96xf32>
    %85 = arith.addf %44, %84 : vector<8x96xf32>
    %c0_22 = arith.constant 0 : index
    %c0_23 = arith.constant 0 : index
    %86 = vector.load %arg4[%c0_22, %c0_23] : memref<96x32xf32, #tpu.memory_space<vmem>>, vector<96x32xf32>
    %cst_24 = arith.constant dense<0.000000e+00> : vector<8x32xf32>
    %87 = tpu.matmul %85, %86, %cst_24 {dimension_numbers = #tpu.dot_dimension_numbers<[1], [0], [0], [1], [0, 0, 1, 1], [], []>} : vector<8x96xf32>, vector<96x32xf32>, vector<8x32xf32> -> vector<8x32xf32>
    %88 = vector.broadcast %2 : vector<1x32xf32> to vector<8x32xf32>
    %89 = arith.addf %87, %88 : vector<8x32xf32>
    %cst_25 = arith.constant 0.000000e+00 : f32
    %90 = vector.broadcast %cst_25 : f32 to vector<8x32xf32>
    %91 = arith.maximumf %89, %90 : vector<8x32xf32>
    %c0_26 = arith.constant 0 : index
    %c0_27 = arith.constant 0 : index
    %92 = vector.load %arg5[%c0_26, %c0_27] : memref<32x128xf32, #tpu.memory_space<vmem>>, vector<32x128xf32>
    %cst_28 = arith.constant dense<0.000000e+00> : vector<8x128xf32>
    %93 = tpu.matmul %91, %92, %cst_28 {dimension_numbers = #tpu.dot_dimension_numbers<[1], [0], [0], [1], [0, 0, 1, 1], [], []>} : vector<8x32xf32>, vector<32x128xf32>, vector<8x128xf32> -> vector<8x128xf32>
    %94 = vector.broadcast %3 : vector<1x128xf32> to vector<8x128xf32>
    %95 = arith.addf %93, %94 : vector<8x128xf32>
    %cst_29 = arith.constant 0.000000e+00 : f32
    %96 = vector.broadcast %cst_29 : f32 to vector<8x128xf32>
    %97 = arith.maximumf %95, %96 : vector<8x128xf32>
    %c0_30 = arith.constant 0 : index
    %c0_31 = arith.constant 0 : index
    %98 = vector.load %arg8[%c0_30, %c0_31] : memref<8x128xf32, #tpu.memory_space<vmem>>, vector<8x128xf32>
    tpu.vector_store %arg8[%c0_30, %c0_31], %97 {strides = array<i32>} : memref<8x128xf32, #tpu.memory_space<vmem>>, vector<8x128xf32>,
    return
  }
  func.func @transform_0(%arg0: i32) -> (i32, i32) {
    %c0_i32 = arith.constant 0 : i32
    %c0_i32_0 = arith.constant 0 : i32
    return %arg0, %c0_i32 : i32, i32
  }
  func.func @transform_1(%arg0: i32) -> (i32, i32) {
    %c0_i32 = arith.constant 0 : i32
    %c0_i32_0 = arith.constant 0 : i32
    %c0_i32_1 = arith.constant 0 : i32
    return %c0_i32, %c0_i32_0 : i32, i32
  }
  func.func @transform_2(%arg0: i32) -> (i32, i32) {
    %c0_i32 = arith.constant 0 : i32
    %c0_i32_0 = arith.constant 0 : i32
    %c0_i32_1 = arith.constant 0 : i32
    return %c0_i32, %c0_i32_0 : i32, i32
  }
  func.func @transform_3(%arg0: i32) -> (i32, i32) {
    %c0_i32 = arith.constant 0 : i32
    %c0_i32_0 = arith.constant 0 : i32
    %c0_i32_1 = arith.constant 0 : i32
    return %c0_i32, %c0_i32_0 : i32, i32
  }
  func.func @transform_4(%arg0: i32) -> (i32, i32) {
    %c0_i32 = arith.constant 0 : i32
    %c0_i32_0 = arith.constant 0 : i32
    %c0_i32_1 = arith.constant 0 : i32
    return %c0_i32, %c0_i32_0 : i32, i32
  }
  func.func @transform_5(%arg0: i32) -> (i32, i32) {
    %c0_i32 = arith.constant 0 : i32
    %c0_i32_0 = arith.constant 0 : i32
    %c0_i32_1 = arith.constant 0 : i32
    return %c0_i32, %c0_i32_0 : i32, i32
  }
  func.func @transform_6(%arg0: i32) -> (i32, i32) {
    %c0_i32 = arith.constant 0 : i32
    %c0_i32_0 = arith.constant 0 : i32
    %c0_i32_1 = arith.constant 0 : i32
    return %c0_i32, %c0_i32_0 : i32, i32
  }
  func.func @transform_7(%arg0: i32) -> (i32, i32) {
    %c0_i32 = arith.constant 0 : i32
    %c0_i32_0 = arith.constant 0 : i32
    return %arg0, %c0_i32 : i32, i32
  }
}

</mosaic_0001>

<bundles_post_ra>
// kernel: decoder_tabnet_forward.1
= control target key start
LH: loop header
LB: loop body
LE: loop exit
PB: predicated region body
PF: predicated region fallthrough
CT: control target
= control target key end

     0   :  { %12 = vsyncpa [#allocation3], 0  ;;  %s1027_s0 = inlined_call_operand.vmem [shape: f32[8,32], index: 0, kind: input, shape index: {}]   ;;  %s1028_s1 = inlined_call_operand.vmem [shape: f32[32,192], index: 1, kind: input, shape index: {}]   ;;  %s1029_s2 = inlined_call_operand.hbm [shape: f32[96,192], index: 2, kind: input, shape index: {}]   ;;  %s1030_s3 = inlined_call_operand.vmem [shape: f32[96,32], index: 3, kind: input, shape index: {}]   ;;  %s1031_s4 = inlined_call_operand.vmem [shape: f32[32,128], index: 4, kind: input, shape index: {}]   ;;  %s1032_s5 = inlined_call_operand.vmem [shape: f32[8,96], index: 5, kind: input, shape index: {}]   ;;  %s1033_s6 = inlined_call_operand.vmem [shape: f32[1,160], index: 6, kind: input, shape index: {}]   ;;  %s1034_s7 = inlined_call_operand.hbm [shape: f32[8,128], index: 7, kind: output, shape index: {}]  }
   0x1   :  { %13 = vsyncpa [#allocation4], 0  ;;  %s808_s24 = smov [#allocation2]   ;;  %s760_s28 = scalar_lea.hbm %s1029_s2, 3072 }
   0x2   :  { %s23_s25 = sshll.u32 %s808_s24, 4  ;;  %p761_p0 = scmp.ne.s32.totalorder %s1029_s2, %s760_s28  ;;  %s24_s25 = int_to_ptr.vmem [resolvable:$true] %s23_s25 }
   0x3   :  { %p764_p1 = scmp.lt.u32.totalorder %s760_s28, %s1029_s2 }
   0x5   :  { %p766_p2 = pnand %p764_p1, %p761_p0 }
   0x7   :  { %769 = shalt.err (!%p766_p2)
}
   0x8   :  { %s770_s10 = scalar_lea.vmem %s24_s25, 3072  ;;  %p775_p4 = scmp.lt.s32.totalorder %s24_s25, %s24_s25 }
   0x9   :  { %p771_p3 = scmp.ne.s32.totalorder %s24_s25, %s770_s10  ;;  %p776_p5 = scmp.lt.s32.totalorder %s770_s10, %s770_s10 }
   0xb   :  { %p777_p6 = por %p776_p5, %p775_p4 }
   0xd   :  { %p778_p7 = pnand %p777_p6, %p771_p3 }
   0xf   :  { %781 = shalt.err (!%p778_p7)
}
  0x10   :  { %s809_s11 = smov 256   ;;  %s810_s12 = smov 16  }
  0x11   :  { %29 = dma.hbm_to_vmem [thread:$0]  %s1029_s2, 3072, %s24_s25, [#allocation3], %s809_s11, %s809_s11, %s810_s12  }
  0x12   :  { %804 = dma.done.wait [#allocation3], 3072  }
  0x13   :  { %805 = vsyncadd [#allocation3], 4294964224  ;;  %v169_v0 = vlaneseq  ;;  %v811_v1 = vmov 0.0   ;;  %v45_v3 = vld [vmem:[%s1028_s1 + $0x8] sm:$0xff]  ;;  %v47_v4 = vld [vmem:[%s1028_s1 + $0x18] sm:$0xff]  ;;  %s812_s9 = smov 96  }
  0x14   :  { %120 = vmatprep.mubr.f32.mxu0 %v811_v1  ;;  %312 = vmatprep.mubr.f32.mxu1 %v811_v1  ;;  %v44_v5 = vld [vmem:[%s1028_s1] sm:$0xff]  ;;  %v671_v7 = vpack.c.bf16 %v47_v4, %v45_v3  ;;  %v46_v8 = vld [vmem:[%s1028_s1 + $0x10] sm:$0xff]  ;;  %v49_v9 = vld [vmem:[%s1028_s1 + $0x28] sm:$0xff]  ;;  %vm52_vm0 = vcmask 261120   ;;  %vm133_vm1 = vcmask 523264   ;;  %vm244_vm2 = vcmask 785408  }
  0x15   :  { %v871_v2 = vshrl.u32 %v169_v0, 7  ;;  %v51_v10 = vld [vmem:[%s1028_s1 + $0x38] sm:$0xff]  ;;  %v673_v11 = vpack.c.bf16 %v46_v8, %v44_v5  ;;  %v48_v13 = vld [vmem:[%s1028_s1 + $0x20] sm:$0xff]  ;;  %v50_v14 = vld [vmem:[%s1028_s1 + $0x30] sm:$0xff]  ;;  %vm815_vm3 = vmmov 0   ;;  %s816_s16 = smov [#allocation5]  }
  0x16   :  { %v675_v12 = vpack.c.bf16 %v51_v10, %v49_v9  ;;  %672 = vmatprep.subr.bf16.mxu0 %v671_v7  ;;  %v902_v16 = vld [vmem:[%s1032_s5] sm:$0xff]  ;;  %v677_v17 = vpack.c.bf16 %v50_v14, %v48_v13  ;;  %v221_v21 = vld [vmem:[#allocation2 + $0x8] sm:$0xff]  ;;  %v223_v22 = vld [vmem:[#allocation2 + $0x18] sm:$0xff] }
  0x17   :  { %v181_v6 = vsub.s32 2, %v871_v2  ;;  %v191_v15 = vsub.s32 3, %v871_v2  ;;  %674 = vmatpush1.bf16.msra.mxu0 %v673_v11  ;;  %v43_v20 = vld [vmem:[%s1027_s0] sm:$0xff]  ;;  %v679_v24 = vpack.c.bf16 %v223_v22, %v221_v21  ;;  %v222_v25 = vld [vmem:[#allocation2 + $0x10] sm:$0xff]  ;;  %v225_v26 = vld [vmem:[#allocation2 + $0x28] sm:$0xff]  ;;  %s813_s0 = smov 32  }
  0x18   :  { %676 = vmatprep.subr.bf16.mxu0 %v675_v12  ;;  %v220_v23 = vld [vmem:[#allocation2] sm:$0xff]  ;;  %v227_v27 = vld [vmem:[#allocation2 + $0x38] sm:$0xff]  ;;  %v226_v31 = vld [vmem:[#allocation2 + $0x30] sm:$0xff] }
  0x19   :  { %v182_v18 = vrot.slane %v902_v16, %v181_v6  ;;  %v192_v19 = vrot.slane %v902_v16, %v191_v15  ;;  %v681_v28 = vpack.c.bf16 %v222_v25, %v220_v23  ;;  %v683_v29 = vpack.c.bf16 %v227_v27, %v225_v26  ;;  %v224_v30 = vld [vmem:[#allocation2 + $0x20] sm:$0xff]  ;;  %v229_v32 = vld [vmem:[#allocation2 + $0x48] sm:$0xff]  ;;  %680 = vmatprep.subr.bf16.mxu1 %v679_v24  ;;  %v231_v33 = vld [vmem:[#allocation2 + $0x58] sm:$0xff] }
  0x1a   :  { %v685_v34 = vpack.c.bf16 %v226_v31, %v224_v30  ;;  %v687_v35 = vpack.c.bf16 %v231_v33, %v229_v32  ;;  %v228_v36 = vld [vmem:[#allocation2 + $0x40] sm:$0xff]  ;;  %v230_v37 = vld [vmem:[#allocation2 + $0x50] sm:$0xff]  ;;  %v233_v38 = vld [vmem:[#allocation2 + $0x68] sm:$0xff] }
  0x1b   :  { %184 = vrot.lane.b32.xlu0 %v182_v18, %s812_s9  ;;  %678 = vmatpush1.bf16.msra.mxu0 %v677_v17  ;;  %v235_v39 = vld [vmem:[#allocation2 + $0x78] sm:$0xff]  ;;  %v689_v40 = vpack.c.bf16 %v230_v37, %v228_v36  ;;  %v232_v42 = vld [vmem:[#allocation2 + $0x60] sm:$0xff]  ;;  %v234_v43 = vld [vmem:[#allocation2 + $0x70] sm:$0xff] }
  0x1c   :  { %682 = vmatpush1.bf16.msra.mxu1 %v681_v28  ;;  %v691_v41 = vpack.c.bf16 %v235_v39, %v233_v38  ;;  %v237_v44 = vld [vmem:[#allocation2 + $0x88] sm:$0xff]  ;;  %v239_v45 = vld [vmem:[#allocation2 + $0x98] sm:$0xff]  ;;  %v693_v46 = vpack.c.bf16 %v234_v43, %v232_v42  ;;  %v236_v37 = vld [vmem:[#allocation2 + $0x80] sm:$0xff] }
  0x1d   :  { %684 = vmatprep.subr.bf16.mxu1 %v683_v29  ;;  %v695_v47 = vpack.c.bf16 %v239_v45, %v237_v44  ;;  %v238_v38 = vld [vmem:[#allocation2 + $0x90] sm:$0xff]  ;;  %v243_v42 = vld [vmem:[#allocation2 + $0xb8] sm:$0xff]  ;;  %v240_v45 = vld [vmem:[#allocation2 + $0xa0] sm:$0xff] }
  0x1e   :  { %607 = vmatmul.mubr.msk.f32.vlgmr.msra.gmra.mrb[0].mxu0 %vm52_vm0, %v43_v20  ;;  %v697_v39 = vpack.c.bf16 %v238_v38, %v236_v37 }
  0x1f   :  { %194 = vrot.lane.b32.xlu0 %v192_v19, %s812_s9  ;;  %657 = vmatprep.mubr.msk.f32.mxu0 %vm815_vm3, %v811_v1 }
  0x20   :  { %686 = vmatpush1.bf16.msra.mxu1 %v685_v34 }
  0x21   :  { %688 = vmatprep.subr.bf16.mxu1 %v687_v35 }
  0x24   :  { %690 = vmatpush1.bf16.msra.mxu1 %v689_v40 }
  0x25   :  { %692 = vmatprep.subr.bf16.mxu1 %v691_v41  ;;  %v241_v41 = vld [vmem:[#allocation2 + $0xa8] sm:$0xff] }
  0x26   :  { %v699_v44 = vpack.c.bf16 %v243_v42, %v241_v41 }
  0x28   :  { %694 = vmatpush1.bf16.msra.mxu1 %v693_v46  ;;  %v242_v46 = vld [vmem:[#allocation2 + $0xb0] sm:$0xff] }
  0x29   :  { %696 = vmatprep.subr.bf16.mxu1 %v695_v47 }
  0x2c   :  { %698 = vmatpush1.bf16.msra.mxu1 %v697_v39 }
  0x2d   :  { %700 = vmatprep.subr.bf16.mxu1 %v699_v44 }
  0x8d   :  { %v185_v25 = vpop.permute.xlu0 %184 }
  0x91   :  { %v195_v28 = vpop.permute.xlu0 %194 }
  0xf1   :  { %v122_v48 = vpop.f32.mrb[0].mxu0 }
  0xf2   :  { %v127_v49 = vrot.slane %v122_v48, 4  ;;  %v124_v50 = vpop.f32.mrb[1].mxu0 }
  0xf3   :  { %v134_v51 = vsel %vm133_vm1, %v124_v50, 0.0 }
  0xf4   :  { %v128_v52 = vadd.f32 %v127_v49, %v122_v48  ;;  %v135_v53 = vrot.slane %v134_v51, 4 }
  0xf6   :  { %v129_v54 = vrot.slane %v128_v52, 2  ;;  %v136_v55 = vadd.f32 %v135_v53, %v134_v51  ;;  %v381_v53 = vsub.s32 7, %v871_v2 }
  0xf8   :  { %v130_v56 = vadd.f32 %v129_v54, %v128_v52  ;;  %v137_v57 = vrot.slane %v136_v55, 2 }
  0xfa   :  { %v131_v58 = vrot.slane %v130_v56, 1  ;;  %v138_v59 = vadd.f32 %v137_v57, %v136_v55  ;;  %v382_v55 = vrot.slane %v902_v16, %v381_v53 }
  0xfc   :  { %v132_v60 = vadd.f32 %v131_v58, %v130_v56  ;;  %v139_v61 = vrot.slane %v138_v59, 1  ;;  %v171_v56 = vsub.s32 0, %v871_v2  ;;  %v176_v58 = vsub.s32 1, %v871_v2 }
  0xfe   :  { %v142_v62 = vmul.f32 0.125, %v132_v60  ;;  %v140_v63 = vadd.f32 %v139_v61, %v138_v59  ;;  %v172_v57 = vrot.slane %v902_v16, %v171_v56  ;;  %v177_v61 = vrot.slane %v902_v16, %v176_v58 }
 0x100   :  { %v144_v0 = vsub.f32 %v122_v48, %v142_v62  ;;  %v143_v3 = vmul.f32 0.125, %v140_v63  ;;  %v701_v48 = vpack.c.bf16 %v242_v46, %v240_v45 }
 0x102   :  { %v146_v4 = vmul.f32 %v144_v0, %v144_v0  ;;  %v145_v5 = vsub.f32 %v124_v50, %v143_v3  ;;  %702 = vmatpush1.bf16.msra.mxu1 %v701_v48  ;;  %v371_v50 = vsub.s32 6, %v871_v2 }
 0x104   :  { %v148_v6 = vrot.slane %v146_v4, 4  ;;  %v147_v7 = vmul.f32 %v145_v5, %v145_v5  ;;  %v372_v51 = vrot.slane %v902_v16, %v371_v50 }
 0x106   :  { %v149_v8 = vadd.f32 %v148_v6, %v146_v4  ;;  %v154_v9 = vsel %vm133_vm1, %v147_v7, 0.0  ;;  %374 = vrot.lane.b32.xlu0 %v372_v51, %s812_s9  ;;  %v411_v4 = vld [vmem:[%s1030_s3] sm:$0xff]  ;;  %v413_v6 = vld [vmem:[%s1030_s3 + $0x10] sm:$0xff]  ;;  %v814_v7 = vmov 0.0|0.0  }
 0x107   :  { %v155_v10 = vrot.slane %v154_v9, 4  ;;  %703 = vmatprep.subr.bf16.mxu0 %v814_v7  ;;  %721 = vmatprep.subr.bf16.mxu1 %v814_v7 }
 0x108   :  { %v150_v11 = vrot.slane %v149_v8, 2 }
 0x109   :  { %v156_v12 = vadd.f32 %v155_v10, %v154_v9  ;;  %v414_v9 = vld [vmem:[%s1030_s3 + $0x18] sm:$0xff] }
 0x10a   :  { %v151_v13 = vadd.f32 %v150_v11, %v149_v8  ;;  %v707_v10 = vpack.c.bf16 %v414_v9, %v413_v6  ;;  %v415_v11 = vld [vmem:[%s1030_s3 + $0x20] sm:$0xff] }
 0x10b   :  { %v157_v14 = vrot.slane %v156_v12, 2 }
 0x10c   :  { %v152_v15 = vrot.slane %v151_v13, 1 }
 0x10d   :  { %v158_v17 = vadd.f32 %v157_v14, %v156_v12  ;;  %v416_v12 = vld [vmem:[%s1030_s3 + $0x28] sm:$0xff]  ;;  %v417_v14 = vld [vmem:[%s1030_s3 + $0x30] sm:$0xff] }
 0x10e   :  { %v153_v18 = vadd.f32 %v152_v15, %v151_v13  ;;  %v710_v13 = vpack.c.bf16 %v416_v12, %v415_v11  ;;  %v418_v15 = vld [vmem:[%s1030_s3 + $0x38] sm:$0xff]  ;;  %v420_v11 = vld [vmem:[%s1030_s3 + $0x48] sm:$0xff] }
 0x10f   :  { %v159_v19 = vrot.slane %v158_v17, 1 }
 0x110   :  { %v161_v20 = vmul.f32 0.125, %v153_v18 }
 0x111   :  { %v160_v21 = vadd.f32 %v159_v19, %v158_v17  ;;  %v713_v17 = vpack.c.bf16 %v418_v15, %v417_v14 }
 0x112   :  { %v163_v22 = vadd.f32 1e-05, %v161_v20 }
 0x113   :  { %v162_v23 = vmul.f32 0.125, %v160_v21 }
 0x114   :  { %736 = vrsqrt.f32 %v163_v22 }
 0x115   :  { %v164_v24 = vadd.f32 1e-05, %v162_v23 }
 0x117   :  { %738 = vrsqrt.f32 %v164_v24 }
 0x11e   :  { %v737_v26 = vpop.eup %736 }
 0x11f   :  { %v167_v27 = vmul.f32 %v737_v26, %v144_v0 }
 0x121   :  { %v739_v29 = vpop.eup %738  ;;  %v187_v30 = vmul.f32 %v185_v25, %v167_v27  ;;  %v173_v59 = vmul.f32 %v172_v57, %v167_v27 }
 0x122   :  { %v168_v31 = vmul.f32 %v739_v29, %v145_v5  ;;  %v412_v5 = vld [vmem:[%s1030_s3 + $0x8] sm:$0xff] }
 0x123   :  { %v197_v32 = vadd.f32 %v195_v28, %v187_v30  ;;  %v178_v63 = vadd.f32 %v177_v61, %v173_v59  ;;  %v704_v8 = vpack.c.bf16 %v412_v5, %v411_v4 }
 0x124   :  { %v188_v33 = vmul.f32 %v185_v25, %v168_v31 }
 0x125   :  { %v608_v34 = vmul.f32 -1.442695, %v197_v32  ;;  %705 = vmatpush3.bf16.msra.mxu0 %v704_v8 }
 0x126   :  { %v198_v35 = vadd.f32 %v195_v28, %v188_v33  ;;  %706 = vmatprep.subr.bf16.mxu0 %v814_v7 }
 0x127   :  { %740 = vpow2.f32 %v608_v34 }
 0x128   :  { %v609_v36 = vmul.f32 -1.442695, %v198_v35 }
 0x129   :  { %708 = vmatpush3.bf16.msra.mxu0 %v707_v10  ;;  %v419_v10 = vld [vmem:[%s1030_s3 + $0x40] sm:$0xff] }
 0x12a   :  { %742 = vpow2.f32 %v609_v36  ;;  %709 = vmatprep.subr.bf16.mxu0 %v814_v7 }
 0x12d   :  { %711 = vmatpush3.bf16.msra.mxu0 %v710_v13  ;;  %v716_v13 = vpack.c.bf16 %v420_v11, %v419_v10 }
 0x12e   :  { %712 = vmatprep.subr.bf16.mxu0 %v814_v7 }
 0x131   :  { %v741_v40 = vpop.eup %740  ;;  %714 = vmatpush3.bf16.msra.mxu0 %v713_v17  ;;  %v421_v17 = vld [vmem:[%s1030_s3 + $0x50] sm:$0xff] }
 0x132   :  { %v205_v43 = vadd.f32 1.0, %v741_v40  ;;  %715 = vmatprep.subr.bf16.mxu0 %v814_v7 }
 0x134   :  { %v743_v47 = vpop.eup %742  ;;  %744 = vrcp.f32 %v205_v43 }
 0x135   :  { %v206_v49 = vadd.f32 1.0, %v743_v47  ;;  %717 = vmatpush3.bf16.msra.mxu0 %v716_v13 }
 0x136   :  { %718 = vmatprep.subr.bf16.mxu0 %v814_v7 }
 0x137   :  { %746 = vrcp.f32 %v206_v49 }
 0x13e   :  { %v745_v52 = vpop.eup %744 }
 0x13f   :  { %213 = vrot.lane.b32.xlu1 %v745_v52, %s813_s0 }
 0x141   :  { %v747_v54 = vpop.eup %746 }
 0x143   :  { %215 = vrot.lane.b32.xlu1 %v747_v54, %s813_s0 }
 0x147   :  { %384 = vrot.lane.b32.xlu1 %v382_v55, %s812_s9 }
 0x178   :  { %v375_v59 = vpop.permute.xlu0 %374 }
 0x1b1   :  { %v214_v60 = vpop.permute.xlu1 %213 }
 0x1b5   :  { %v216_v62 = vpop.permute.xlu1 %215 }
 0x1b6   :  { %v217_v0 = vsel %vm52_vm0, %v214_v60, %v216_v62 }
 0x1b7   :  { %v931_v3 = vmul.f32 %v217_v0, %v178_v63 }
 0x1b9   :  { %610 = vmatmul.mubr.msk.f32.vlgmr.msra.gmra.mrb[0].mxu1 %vm244_vm2, %v931_v3  ;;  %v385_v61 = vpop.permute.xlu1 %384 }
 0x1ba   :  { %668 = vmatprep.mubr.msk.f32.mxu1 %vm815_vm3, %v811_v1 }
 0x28c   :  { %v314_v18 = vpop.f32.mrb[0].mxu1 }
 0x28d   :  { %v319_v19 = vrot.slane %v314_v18, 4  ;;  %v316_v20 = vpop.f32.mrb[1].mxu1 }
 0x28e   :  { %v325_v21 = vsel %vm133_vm1, %v316_v20, 0.0 }
 0x28f   :  { %v320_v22 = vadd.f32 %v319_v19, %v314_v18  ;;  %v326_v23 = vrot.slane %v325_v21, 4 }
 0x291   :  { %v321_v24 = vrot.slane %v320_v22, 2  ;;  %v327_v25 = vadd.f32 %v326_v23, %v325_v21  ;;  %v503_v21 = vld [vmem:[%s1031_s4] sm:$0xff] }
 0x293   :  { %v322_v26 = vadd.f32 %v321_v24, %v320_v22  ;;  %v328_v27 = vrot.slane %v327_v25, 2  ;;  %v504_v22 = vld [vmem:[%s1031_s4 + $0x8] sm:$0xff] }
 0x294   :  { %v722_v23 = vpack.c.bf16 %v504_v22, %v503_v21 }
 0x295   :  { %v323_v28 = vrot.slane %v322_v26, 1  ;;  %v329_v29 = vadd.f32 %v328_v27, %v327_v25  ;;  %v42_v25 = vld [vmem:[%s1033_s6] sm:$0x3]  ;;  %v361_v27 = vsub.s32 4, %v871_v2 }
 0x296   :  { %723 = vmatpush3.bf16.msra.mxu1 %v722_v23 }
 0x297   :  { %v324_v30 = vadd.f32 %v323_v28, %v322_v26  ;;  %v330_v31 = vrot.slane %v329_v29, 1  ;;  %724 = vmatprep.subr.bf16.mxu1 %v814_v7  ;;  %v427_v26 = vrot.slane %v42_v25, %v171_v56  ;;  %v362_v28 = vrot.slane %v902_v16, %v361_v27 }
 0x299   :  { %v332_v32 = vmul.f32 0.125, %v324_v30  ;;  %v331_v33 = vadd.f32 %v330_v31, %v329_v29  ;;  %v366_v29 = vsub.s32 5, %v871_v2 }
 0x29b   :  { %v334_v34 = vsub.f32 %v314_v18, %v332_v32  ;;  %v333_v35 = vmul.f32 0.125, %v331_v33  ;;  %v422_v18 = vld [vmem:[%s1030_s3 + $0x58] sm:$0xff]  ;;  %v367_v31 = vrot.slane %v902_v16, %v366_v29  ;;  %v510_v16 = vrot.slane %v42_v25, %v176_v58 }
 0x29d   :  { %v336_v36 = vmul.f32 %v334_v34, %v334_v34  ;;  %v335_v37 = vsub.f32 %v316_v20, %v333_v35  ;;  %v719_v20 = vpack.c.bf16 %v422_v18, %v421_v17 }
 0x29f   :  { %v338_v38 = vrot.slane %v336_v36, 4  ;;  %v337_v39 = vmul.f32 %v335_v37, %v335_v37  ;;  %720 = vmatpush3.bf16.msra.mxu0 %v719_v20 }
 0x2a1   :  { %v339_v40 = vadd.f32 %v338_v38, %v336_v36  ;;  %v344_v41 = vsel %vm133_vm1, %v337_v39, 0.0  ;;  %v505_v36 = vld [vmem:[%s1031_s4 + $0x10] sm:$0xff] }
 0x2a2   :  { %v345_v42 = vrot.slane %v344_v41, 4 }
 0x2a3   :  { %v340_v43 = vrot.slane %v339_v40, 2 }
 0x2a4   :  { %v346_v44 = vadd.f32 %v345_v42, %v344_v41 }
 0x2a5   :  { %v341_v45 = vadd.f32 %v340_v43, %v339_v40 }
 0x2a6   :  { %v347_v46 = vrot.slane %v346_v44, 2 }
 0x2a7   :  { %v342_v47 = vrot.slane %v341_v45, 1 }
 0x2a8   :  { %v348_v48 = vadd.f32 %v347_v46, %v346_v44 }
 0x2a9   :  { %v343_v49 = vadd.f32 %v342_v47, %v341_v45 }
 0x2aa   :  { %v349_v50 = vrot.slane %v348_v48, 1 }
 0x2ab   :  { %v351_v51 = vmul.f32 0.125, %v343_v49 }
 0x2ac   :  { %v350_v52 = vadd.f32 %v349_v50, %v348_v48 }
 0x2ad   :  { %v353_v53 = vadd.f32 1e-05, %v351_v51 }
 0x2ae   :  { %v352_v54 = vmul.f32 0.125, %v350_v52 }
 0x2af   :  { %748 = vrsqrt.f32 %v353_v53 }
 0x2b0   :  { %v354_v55 = vadd.f32 1e-05, %v352_v54 }
 0x2b2   :  { %750 = vrsqrt.f32 %v354_v55 }
 0x2b9   :  { %v749_v57 = vpop.eup %748 }
 0x2ba   :  { %v357_v60 = vmul.f32 %v749_v57, %v334_v34 }
 0x2bc   :  { %v751_v62 = vpop.eup %750  ;;  %v377_v63 = vmul.f32 %v375_v59, %v357_v60  ;;  %v363_v30 = vmul.f32 %v362_v28, %v357_v60 }
 0x2bd   :  { %v358_v0 = vmul.f32 %v751_v62, %v335_v37  ;;  %v506_v37 = vld [vmem:[%s1031_s4 + $0x18] sm:$0xff]  ;;  %s598_s4 = sshll.u32 %s816_s16, 4  ;;  %s599_s4 = int_to_ptr.vmem [resolvable:$true] %s598_s4 }
 0x2be   :  { %v387_v4 = vadd.f32 %v385_v61, %v377_v63  ;;  %v368_v32 = vadd.f32 %v367_v31, %v363_v30  ;;  %v725_v38 = vpack.c.bf16 %v506_v37, %v505_v36  ;;  %s782_s17 = scalar_lea.vmem %s599_s4, 128  ;;  %p787_p9 = scmp.lt.s32.totalorder %s599_s4, %s599_s4 }
 0x2bf   :  { %v378_v5 = vmul.f32 %v375_v59, %v358_v0  ;;  %p783_p8 = scmp.ne.s32.totalorder %s599_s4, %s782_s17  ;;  %p788_p10 = scmp.lt.s32.totalorder %s782_s17, %s782_s17 }
 0x2c0   :  { %v611_v6 = vmul.f32 -1.442695, %v387_v4  ;;  %726 = vmatpush3.bf16.msra.mxu1 %v725_v38 }
 0x2c1   :  { %v388_v8 = vadd.f32 %v385_v61, %v378_v5  ;;  %p789_p11 = por %p788_p10, %p787_p9 }
 0x2c2   :  { %752 = vpow2.f32 %v611_v6 }
 0x2c3   :  { %v612_v9 = vmul.f32 -1.442695, %v388_v8  ;;  %p790_p12 = pnand %p789_p11, %p783_p8 }
 0x2c5   :  { %754 = vpow2.f32 %v612_v9 }
 0x2cc   :  { %v753_v12 = vpop.eup %752 }
 0x2cd   :  { %v395_v14 = vadd.f32 1.0, %v753_v12 }
 0x2cf   :  { %v755_v15 = vpop.eup %754  ;;  %756 = vrcp.f32 %v395_v14 }
 0x2d0   :  { %v396_v19 = vadd.f32 1.0, %v755_v15 }
 0x2d2   :  { %758 = vrcp.f32 %v396_v19 }
 0x2d9   :  { %v757_v24 = vpop.eup %756 }
 0x2da   :  { %403 = vrot.lane.b32.xlu0 %v757_v24, %s813_s0 }
 0x2dc   :  { %v759_v1 = vpop.eup %758 }
 0x2dd   :  { %405 = vrot.lane.b32.xlu1 %v759_v1, %s813_s0 }
 0x2de   :  { %511 = vrot.lane.b32.xlu0 %v427_v26, %s812_s9 }
 0x2e1   :  { %513 = vrot.lane.b32.xlu1 %v510_v16, %s812_s9 }
 0x34c   :  { %v404_v7 = vpop.permute.xlu0 %403 }
 0x34f   :  { %v406_v33 = vpop.permute.xlu1 %405 }
 0x350   :  { %v407_v34 = vsel %vm52_vm0, %v404_v7, %v406_v33  ;;  %v512_v42 = vpop.permute.xlu0 %511 }
 0x351   :  { %v409_v35 = vmul.f32 %v407_v34, %v368_v32 }
 0x353   :  { %v410_v56 = vadd.f32 %v409_v35, %v931_v3  ;;  %v514_v43 = vpop.permute.xlu1 %513 }
 0x354   :  { %v515_v44 = vsel %vm244_vm2, %v512_v42, %v514_v43 }
 0x355   :  { %658 = vmatmul.mubr.msk.f32.vlgmr.msra.gmra.mrb[2].mxu0 %vm244_vm2, %v410_v56 }
 0x428   :  { %v498_v39 = vpop.f32.mrb[2].mxu0 }
 0x429   :  { %v499_v40 = vadd.f32 %v498_v39, %v427_v26  ;;  %v659_v3 = vpop.f32.mrb[3].mxu0 }
 0x42b   :  { %v502_v41 = vmax.f32 %v499_v40, 0.0 }
 0x42d   :  { %669 = vmatmul.mubr.msk.f32.vlgmr.msra.gmra.mrb[2].mxu1 %vm52_vm0, %v502_v41 }
 0x500   :  { %v586_v45 = vpop.f32.mrb[2].mxu1 }
 0x501   :  { %v587_v46 = vadd.f32 %v586_v45, %v515_v44  ;;  %v670_v47 = vpop.f32.mrb[3].mxu1 }
 0x503   :  { %v590_v48 = vmax.f32 %v587_v46, 0.0 }
 0x505   :  { %591 = vst [vmem:[#allocation5] sm:$0xff] %v590_v48 }
 0x506   :  { %793 = shalt.err (!%p790_p12)
}
 0x507   :  { %s794_s19 = scalar_lea.hbm %s1034_s7, 128 }
 0x508   :  { %p795_p13 = scmp.ne.s32.totalorder %s1034_s7, %s794_s19  ;;  %p798_p0 = scmp.lt.u32.totalorder %s794_s19, %s1034_s7 }
 0x50a   :  { %p800_p1 = pnand %p798_p0, %p795_p13 }
 0x50c   :  { %803 = shalt.err (!%p800_p1)
}
 0x50d   :  { %601 = dma.vmem_to_hbm [thread:$0]  %s599_s4, 128, %s1034_s7, [#allocation4]  }
 0x50e   :  { %806 = dma.done.wait [#allocation4], 128  }
 0x50f   :  { %807 = vsyncadd [#allocation4], 4294967168 }
 0x510   :  { %605 = vsyncpa [#allocation3], 1 }
 0x511   :  { %606 = vsyncpa [#allocation4], 1 }

</bundles_post_ra>
